<compile_context>
chip_gen: v7x
topology: tpu7x:2x2x1
jax: 0.10.0
libtpu: 0.0.40
codegen_flags: <defaults>
</compile_context>

<pallas_src>
import numpy as np
import jax
import jax.numpy as jnp
from jax.experimental import pallas as pl
from jax.experimental.pallas import tpu as pltpu

B, CIN, H, W = 2, 4, 16, 16
COUT = 8
NCLS = 10
KH = KW = 3

PADP = (H + 2) * (W + 2)                 # flattened zero-padded image size per batch (324)
NP = B * PADP                            # conv compute width (lane axis) over all batches (648)
MARGIN = W + 3                           # max |tap offset| in flattened coords (19)
LTOT = NP + 2 * MARGIN                   # kernel input lane length (686)
# Flattened-coordinate offset of tap (dh, dw); same (dh outer, dw inner) order as the weights.
TAP_OFFSETS = tuple((dh - 1) * (W + 2) + (dw - 1) for dh in range(KH) for dw in range(KW))


# ---------------------------------------------------------------------------
# Fused Pallas kernel: conv(3x3)+bias+ReLU -> masked mean pool -> linear head
# ---------------------------------------------------------------------------
def fused_forward_kernel(x_ref, w_ref, cb_ref, wf_ref, hb_ref, pool_ref, o_ref):
    # x:    (CIN, LTOT)    flattened zero-padded images + margins, channels on sublanes
    # w:    (9, COUT, CIN) one (COUT, CIN) weight slice per 3x3 tap
    # cb:   (COUT, 1)      conv bias (lane-broadcast)
    # wf:   (NCLS, COUT)   classifier weight, transposed
    # hb:   (NCLS, 1)      classifier bias
    # pool: (NP, B)        masked average-pool matrix: 1/(H*W) at valid spatial positions
    # o:    (NCLS, B)      logits, transposed
    feat_t = jnp.zeros((COUT, NP), dtype=jnp.float32)
    for t in range(KH * KW):                                   # unrolled: 9 shifted matmuls
        start = MARGIN + TAP_OFFSETS[t]
        x_shift = x_ref[:, start:start + NP]                   # (CIN, NP) static lane slice
        feat_t = feat_t + jnp.dot(w_ref[t], x_shift,
                                  preferred_element_type=jnp.float32)
    feat_t = jnp.maximum(feat_t + cb_ref[...], 0.0)            # bias + ReLU on lane-dense vregs
    # Garbage at pad/margin positions is finite and masked out by the pooling matrix.
    pooled_t = jnp.dot(feat_t, pool_ref[...],
                       preferred_element_type=jnp.float32)     # (COUT, B) = masked mean pool
    # meta @ head_wm is identically zero (WrappedModel always passes meta = zeros) -> dropped.
    o_ref[...] = jnp.dot(wf_ref[...], pooled_t,
                         preferred_element_type=jnp.float32) + hb_ref[...]


def _build_pool_matrix():
    mask = np.zeros((H + 2, W + 2), np.float32)
    mask[1:H + 1, 1:W + 1] = 1.0 / (H * W)
    pool = np.zeros((NP, B), np.float32)
    for b in range(B):
        pool[b * PADP:(b + 1) * PADP, b] = mask.reshape(-1)
    return pool


_POOL_MAT = _build_pool_matrix()


# ---------------------------------------------------------------------------
# Wrapper (mirrors WrappedModel.forward)
# ---------------------------------------------------------------------------
def wrapped_model_forward(paired_img_nchw, params):
    """Mirrors WrappedModel.forward: builds meta=zeros(B,2) (identically zero -> dead path)."""
    x = paired_img_nchw.astype(jnp.float32)                       # (B, CIN, H, W)
    xt = jnp.transpose(x, (1, 0, 2, 3))                           # (CIN, B, H, W)
    xp = jnp.pad(xt, ((0, 0), (0, 0), (1, 1), (1, 1)))            # zero-pad H, W by 1
    x_flat = jnp.pad(xp.reshape(CIN, NP), ((0, 0), (MARGIN, MARGIN)))   # (CIN, LTOT)

    pool_mat = jnp.asarray(_POOL_MAT)

    vmem = pl.BlockSpec(memory_space=pltpu.MemorySpace.VMEM)
    logits_t = pl.pallas_call(
        fused_forward_kernel,
        out_shape=jax.ShapeDtypeStruct((NCLS, B), jnp.float32),
        in_specs=[vmem, vmem, vmem, vmem, vmem, vmem],
        out_specs=vmem,
    )(x_flat, params["conv_w_taps"], params["conv_b_col"],
      params["head_wf_t"], params["head_b_col"], pool_mat)

    return logits_t.T                                             # (B, NCLS)


# ---------------------------------------------------------------------------
# Pure-JAX reference (PyTorch-equivalent semantics) for correctness checking
# ---------------------------------------------------------------------------
def im2col_3x3(x_nhwc):
    b, h, w, c = x_nhwc.shape
    xp = jnp.pad(x_nhwc, ((0, 0), (1, 1), (1, 1), (0, 0)))
    cols = [xp[:, dh:dh + h, dw:dw + w, :] for dh in range(KH) for dw in range(KW)]
    return jnp.concatenate(cols, axis=-1)                         # (B, H, W, 9*Cin)


def reference_forward(paired_img_nchw, params):
    batch = paired_img_nchw.shape[0]
    meta = jnp.zeros((batch, 2), dtype=jnp.float32)               # as WrappedModel builds it
    x = jnp.transpose(paired_img_nchw, (0, 2, 3, 1)).astype(jnp.float32)
    patches = im2col_3x3(x).reshape(batch * H * W, KH * KW * CIN)
    feat = jnp.maximum(patches @ params["conv_w_im2col"] + params["conv_b"], 0.0)
    pooled = feat.reshape(batch, H * W, COUT).mean(axis=1)
    logits = pooled @ params["head_wf"] + meta @ params["head_wm"] + params["head_b"]
    return logits


def init_params(key):
    k1, k2, k3, k4 = jax.random.split(key, 4)
    conv_w_pt = jax.random.normal(k1, (COUT, CIN, KH, KW), jnp.float32) * 0.1
    conv_b = jax.random.normal(k2, (1, COUT), jnp.float32) * 0.1
    head_w = jax.random.normal(k3, (COUT + 2, NCLS), jnp.float32) * 0.1
    head_b = jax.random.normal(k4, (1, NCLS), jnp.float32) * 0.1
    return {
        # reference (PyTorch-equivalent) layouts
        "conv_w_im2col": jnp.transpose(conv_w_pt, (2, 3, 1, 0)).reshape(KH * KW * CIN, COUT),
        "conv_b": conv_b,
        "head_wf": head_w[:COUT],
        "head_wm": head_w[COUT:],       # multiplies meta == zeros -> unused by the kernel
        "head_b": head_b,
        # kernel layouts (transposed, lane-dense orientation)
        "conv_w_taps": jnp.transpose(conv_w_pt, (2, 3, 0, 1)).reshape(KH * KW, COUT, CIN),
        "conv_b_col": conv_b.reshape(COUT, 1),
        "head_wf_t": head_w[:COUT].T,   # (NCLS, COUT)
        "head_b_col": head_b.reshape(NCLS, 1),
    }


if __name__ == "__main__":
    key = jax.random.PRNGKey(0)
    kx, kp = jax.random.split(key)
    paired_img = jax.random.normal(kx, (B, CIN, H, W), jnp.float32)   # NCHW input
    params = init_params(kp)

    out = jax.block_until_ready(jax.jit(wrapped_model_forward)(paired_img, params))
    ref = jax.block_until_ready(reference_forward(paired_img, params))

    assert out.shape == (B, NCLS) and out.dtype == jnp.float32
    assert np.allclose(np.asarray(out), np.asarray(ref), atol=1e-4, rtol=1e-4)
    print("KERNEL_OK")
</pallas_src>

<mosaic_0001>
module attributes {stable_mosaic.version = 11 : i64} {
  func.func @fused_forward_kernel(%arg0: memref<4x686xf32, #tpu.memory_space<vmem>>, %arg1: memref<9x8x4xf32, #tpu.memory_space<vmem>>, %arg2: memref<8x1xf32, #tpu.memory_space<vmem>>, %arg3: memref<10x8xf32, #tpu.memory_space<vmem>>, %arg4: memref<10x1xf32, #tpu.memory_space<vmem>>, %arg5: memref<648x2xf32, #tpu.memory_space<vmem>>, %arg6: memref<10x2xf32, #tpu.memory_space<vmem>>) attributes {dimension_semantics = [], scalar_prefetch = 0 : i64, scratch_operands = 0 : i64, tpu.core_type = #tpu.core_type<tc>} {
    %cst = arith.constant 0.000000e+00 : f32
    %0 = vector.broadcast %cst : f32 to vector<8x648xf32>
    %c0 = arith.constant 0 : index
    %c0_0 = arith.constant 0 : index
    %1 = vector.load %arg0[%c0, %c0_0] : memref<4x686xf32, #tpu.memory_space<vmem>>, vector<4x648xf32>
    %c0_1 = arith.constant 0 : index
    %c0_2 = arith.constant 0 : index
    %c0_3 = arith.constant 0 : index
    %2 = vector.load %arg1[%c0_1, %c0_2, %c0_3] : memref<9x8x4xf32, #tpu.memory_space<vmem>>, vector<1x8x4xf32>
    %3 = vector.shape_cast %2 : vector<1x8x4xf32> to vector<8x4xf32>
    %cst_4 = arith.constant dense<0.000000e+00> : vector<8x648xf32>
    %4 = tpu.matmul %3, %1, %cst_4 {dimension_numbers = #tpu.dot_dimension_numbers<[1], [0], [0], [1], [0, 0, 1, 1], [], []>} : vector<8x4xf32>, vector<4x648xf32>, vector<8x648xf32> -> vector<8x648xf32>
    %5 = arith.addf %0, %4 : vector<8x648xf32>
    %c0_5 = arith.constant 0 : index
    %c1 = arith.constant 1 : index
    %6 = vector.load %arg0[%c0_5, %c1] : memref<4x686xf32, #tpu.memory_space<vmem>>, vector<4x648xf32>
    %c1_6 = arith.constant 1 : index
    %c0_7 = arith.constant 0 : index
    %c0_8 = arith.constant 0 : index
    %7 = vector.load %arg1[%c1_6, %c0_7, %c0_8] : memref<9x8x4xf32, #tpu.memory_space<vmem>>, vector<1x8x4xf32>
    %8 = vector.shape_cast %7 : vector<1x8x4xf32> to vector<8x4xf32>
    %cst_9 = arith.constant dense<0.000000e+00> : vector<8x648xf32>
    %9 = tpu.matmul %8, %6, %cst_9 {dimension_numbers = #tpu.dot_dimension_numbers<[1], [0], [0], [1], [0, 0, 1, 1], [], []>} : vector<8x4xf32>, vector<4x648xf32>, vector<8x648xf32> -> vector<8x648xf32>
    %10 = arith.addf %5, %9 : vector<8x648xf32>
    %c0_10 = arith.constant 0 : index
    %c2 = arith.constant 2 : index
    %11 = vector.load %arg0[%c0_10, %c2] : memref<4x686xf32, #tpu.memory_space<vmem>>, vector<4x648xf32>
    %c2_11 = arith.constant 2 : index
    %c0_12 = arith.constant 0 : index
    %c0_13 = arith.constant 0 : index
    %12 = vector.load %arg1[%c2_11, %c0_12, %c0_13] : memref<9x8x4xf32, #tpu.memory_space<vmem>>, vector<1x8x4xf32>
    %13 = vector.shape_cast %12 : vector<1x8x4xf32> to vector<8x4xf32>
    %cst_14 = arith.constant dense<0.000000e+00> : vector<8x648xf32>
    %14 = tpu.matmul %13, %11, %cst_14 {dimension_numbers = #tpu.dot_dimension_numbers<[1], [0], [0], [1], [0, 0, 1, 1], [], []>} : vector<8x4xf32>, vector<4x648xf32>, vector<8x648xf32> -> vector<8x648xf32>
    %15 = arith.addf %10, %14 : vector<8x648xf32>
    %c0_15 = arith.constant 0 : index
    %c18 = arith.constant 18 : index
    %16 = vector.load %arg0[%c0_15, %c18] : memref<4x686xf32, #tpu.memory_space<vmem>>, vector<4x648xf32>
    %c3 = arith.constant 3 : index
    %c0_16 = arith.constant 0 : index
    %c0_17 = arith.constant 0 : index
    %17 = vector.load %arg1[%c3, %c0_16, %c0_17] : memref<9x8x4xf32, #tpu.memory_space<vmem>>, vector<1x8x4xf32>
    %18 = vector.shape_cast %17 : vector<1x8x4xf32> to vector<8x4xf32>
    %cst_18 = arith.constant dense<0.000000e+00> : vector<8x648xf32>
    %19 = tpu.matmul %18, %16, %cst_18 {dimension_numbers = #tpu.dot_dimension_numbers<[1], [0], [0], [1], [0, 0, 1, 1], [], []>} : vector<8x4xf32>, vector<4x648xf32>, vector<8x648xf32> -> vector<8x648xf32>
    %20 = arith.addf %15, %19 : vector<8x648xf32>
    %c0_19 = arith.constant 0 : index
    %c19 = arith.constant 19 : index
    %21 = vector.load %arg0[%c0_19, %c19] : memref<4x686xf32, #tpu.memory_space<vmem>>, vector<4x648xf32>
    %c4 = arith.constant 4 : index
    %c0_20 = arith.constant 0 : index
    %c0_21 = arith.constant 0 : index
    %22 = vector.load %arg1[%c4, %c0_20, %c0_21] : memref<9x8x4xf32, #tpu.memory_space<vmem>>, vector<1x8x4xf32>
    %23 = vector.shape_cast %22 : vector<1x8x4xf32> to vector<8x4xf32>
    %cst_22 = arith.constant dense<0.000000e+00> : vector<8x648xf32>
    %24 = tpu.matmul %23, %21, %cst_22 {dimension_numbers = #tpu.dot_dimension_numbers<[1], [0], [0], [1], [0, 0, 1, 1], [], []>} : vector<8x4xf32>, vector<4x648xf32>, vector<8x648xf32> -> vector<8x648xf32>
    %25 = arith.addf %20, %24 : vector<8x648xf32>
    %c0_23 = arith.constant 0 : index
    %c20 = arith.constant 20 : index
    %26 = vector.load %arg0[%c0_23, %c20] : memref<4x686xf32, #tpu.memory_space<vmem>>, vector<4x648xf32>
    %c5 = arith.constant 5 : index
    %c0_24 = arith.constant 0 : index
    %c0_25 = arith.constant 0 : index
    %27 = vector.load %arg1[%c5, %c0_24, %c0_25] : memref<9x8x4xf32, #tpu.memory_space<vmem>>, vector<1x8x4xf32>
    %28 = vector.shape_cast %27 : vector<1x8x4xf32> to vector<8x4xf32>
    %cst_26 = arith.constant dense<0.000000e+00> : vector<8x648xf32>
    %29 = tpu.matmul %28, %26, %cst_26 {dimension_numbers = #tpu.dot_dimension_numbers<[1], [0], [0], [1], [0, 0, 1, 1], [], []>} : vector<8x4xf32>, vector<4x648xf32>, vector<8x648xf32> -> vector<8x648xf32>
    %30 = arith.addf %25, %29 : vector<8x648xf32>
    %c0_27 = arith.constant 0 : index
    %c36 = arith.constant 36 : index
    %31 = vector.load %arg0[%c0_27, %c36] : memref<4x686xf32, #tpu.memory_space<vmem>>, vector<4x648xf32>
    %c6 = arith.constant 6 : index
    %c0_28 = arith.constant 0 : index
    %c0_29 = arith.constant 0 : index
    %32 = vector.load %arg1[%c6, %c0_28, %c0_29] : memref<9x8x4xf32, #tpu.memory_space<vmem>>, vector<1x8x4xf32>
    %33 = vector.shape_cast %32 : vector<1x8x4xf32> to vector<8x4xf32>
    %cst_30 = arith.constant dense<0.000000e+00> : vector<8x648xf32>
    %34 = tpu.matmul %33, %31, %cst_30 {dimension_numbers = #tpu.dot_dimension_numbers<[1], [0], [0], [1], [0, 0, 1, 1], [], []>} : vector<8x4xf32>, vector<4x648xf32>, vector<8x648xf32> -> vector<8x648xf32>
    %35 = arith.addf %30, %34 : vector<8x648xf32>
    %c0_31 = arith.constant 0 : index
    %c37 = arith.constant 37 : index
    %36 = vector.load %arg0[%c0_31, %c37] : memref<4x686xf32, #tpu.memory_space<vmem>>, vector<4x648xf32>
    %c7 = arith.constant 7 : index
    %c0_32 = arith.constant 0 : index
    %c0_33 = arith.constant 0 : index
    %37 = vector.load %arg1[%c7, %c0_32, %c0_33] : memref<9x8x4xf32, #tpu.memory_space<vmem>>, vector<1x8x4xf32>
    %38 = vector.shape_cast %37 : vector<1x8x4xf32> to vector<8x4xf32>
    %cst_34 = arith.constant dense<0.000000e+00> : vector<8x648xf32>
    %39 = tpu.matmul %38, %36, %cst_34 {dimension_numbers = #tpu.dot_dimension_numbers<[1], [0], [0], [1], [0, 0, 1, 1], [], []>} : vector<8x4xf32>, vector<4x648xf32>, vector<8x648xf32> -> vector<8x648xf32>
    %40 = arith.addf %35, %39 : vector<8x648xf32>
    %c0_35 = arith.constant 0 : index
    %c38 = arith.constant 38 : index
    %41 = vector.load %arg0[%c0_35, %c38] : memref<4x686xf32, #tpu.memory_space<vmem>>, vector<4x648xf32>
    %c8 = arith.constant 8 : index
    %c0_36 = arith.constant 0 : index
    %c0_37 = arith.constant 0 : index
    %42 = vector.load %arg1[%c8, %c0_36, %c0_37] : memref<9x8x4xf32, #tpu.memory_space<vmem>>, vector<1x8x4xf32>
    %43 = vector.shape_cast %42 : vector<1x8x4xf32> to vector<8x4xf32>
    %cst_38 = arith.constant dense<0.000000e+00> : vector<8x648xf32>
    %44 = tpu.matmul %43, %41, %cst_38 {dimension_numbers = #tpu.dot_dimension_numbers<[1], [0], [0], [1], [0, 0, 1, 1], [], []>} : vector<8x4xf32>, vector<4x648xf32>, vector<8x648xf32> -> vector<8x648xf32>
    %45 = arith.addf %40, %44 : vector<8x648xf32>
    %c0_39 = arith.constant 0 : index
    %c0_40 = arith.constant 0 : index
    %46 = vector.load %arg2[%c0_39, %c0_40] : memref<8x1xf32, #tpu.memory_space<vmem>>, vector<8x1xf32>
    %47 = vector.broadcast %46 : vector<8x1xf32> to vector<8x648xf32>
    %48 = arith.addf %45, %47 : vector<8x648xf32>
    %cst_41 = arith.constant 0.000000e+00 : f32
    %49 = vector.broadcast %cst_41 : f32 to vector<8x648xf32>
    %50 = arith.maximumf %48, %49 : vector<8x648xf32>
    %c0_42 = arith.constant 0 : index
    %c0_43 = arith.constant 0 : index
    %51 = vector.load %arg5[%c0_42, %c0_43] : memref<648x2xf32, #tpu.memory_space<vmem>>, vector<648x2xf32>
    %cst_44 = arith.constant dense<0.000000e+00> : vector<8x2xf32>
    %52 = tpu.matmul %50, %51, %cst_44 {dimension_numbers = #tpu.dot_dimension_numbers<[1], [0], [0], [1], [0, 0, 1, 1], [], []>} : vector<8x648xf32>, vector<648x2xf32>, vector<8x2xf32> -> vector<8x2xf32>
    %c0_45 = arith.constant 0 : index
    %c0_46 = arith.constant 0 : index
    %53 = vector.load %arg3[%c0_45, %c0_46] : memref<10x8xf32, #tpu.memory_space<vmem>>, vector<10x8xf32>
    %cst_47 = arith.constant dense<0.000000e+00> : vector<10x2xf32>
    %54 = tpu.matmul %53, %52, %cst_47 {dimension_numbers = #tpu.dot_dimension_numbers<[1], [0], [0], [1], [0, 0, 1, 1], [], []>} : vector<10x8xf32>, vector<8x2xf32>, vector<10x2xf32> -> vector<10x2xf32>
    %c0_48 = arith.constant 0 : index
    %c0_49 = arith.constant 0 : index
    %55 = vector.load %arg4[%c0_48, %c0_49] : memref<10x1xf32, #tpu.memory_space<vmem>>, vector<10x1xf32>
    %56 = vector.broadcast %55 : vector<10x1xf32> to vector<10x2xf32>
    %57 = arith.addf %54, %56 : vector<10x2xf32>
    %c0_50 = arith.constant 0 : index
    %c0_51 = arith.constant 0 : index
    %58 = vector.load %arg6[%c0_50, %c0_51] : memref<10x2xf32, #tpu.memory_space<vmem>>, vector<10x2xf32>
    tpu.vector_store %arg6[%c0_50, %c0_51], %57 {strides = array<i32>} : memref<10x2xf32, #tpu.memory_space<vmem>>, vector<10x2xf32>,
    return
  }
}

</mosaic_0001>

<bundles_post_ra>
// kernel: wrapped_model_forward.1
= control target key start
LH: loop header
LB: loop body
LE: loop exit
PB: predicated region body
PF: predicated region fallthrough
CT: control target
= control target key end

     0   :  { %v3090_v2 = vmov 0.0   ;;  %s3091_s25 = smov 127   ;;  %s3092_s28 = smov 126   ;;  %v3099_v7 = vmov 0   ;;  %vm47_vm0 = vcmask 1039360   ;;  %vm57_vm1 = vcmask 1043456   ;;  %s3751_s0 = inlined_call_operand.vmem [shape: f32[4,686], index: 0, kind: input, shape index: {}]   ;;  %s3752_s2 = inlined_call_operand.vmem [shape: f32[8,1], index: 2, kind: input, shape index: {}]   ;;  %s3753_s1 = inlined_call_operand.vmem [shape: f32[9,8,4], index: 1, kind: input, shape index: {}]   ;;  %s3754_s5 = inlined_call_operand.vmem [shape: f32[648,2], index: 5, kind: input, shape index: {}]   ;;  %s3755_s3 = inlined_call_operand.vmem [shape: f32[10,8], index: 3, kind: input, shape index: {}]   ;;  %s3756_s4 = inlined_call_operand.vmem [shape: f32[10,1], index: 4, kind: input, shape index: {}]   ;;  %s3757_s6 = inlined_call_operand.vmem [shape: f32[10,2], index: 6, kind: output, shape index: {}]  }
   0x1   :  { %v3139_v0 = vld [vmem:[%s3751_s0 + $0x8] sm:$0xff]  ;;  %v3144_v1 = vld [vmem:[%s3751_s0] sm:$0xff]  ;;  %134 = vmatprep.mubr.f32.mxu0 %v3090_v2  ;;  %205 = vmatprep.mubr.f32.mxu1 %v3090_v2  ;;  %v3157_v4 = vld [vmem:[%s3751_s0 + $0x10] sm:$0xff]  ;;  %s3093_s0 = smov 110   ;;  %s3094_s29 = smov 109   ;;  %vm53_vm2 = vcmask 31744  }
   0x2   :  { %39 = vrot.lane.b32.xlu0 %v3139_v0, %s3091_s25  ;;  %35 = vrot.lane.b32.xlu1 %v3144_v1, %s3091_s25  ;;  %v3152_v3 = vcombine.high %v3144_v1, %v3144_v1  ;;  %v3163_v5 = vcombine.high %v3157_v4, %v3157_v4  ;;  %v3175_v6 = vcombine.high %v3139_v0, %v3139_v0  ;;  %s3095_s30 = smov 108   ;;  %s3096_s7 = smov 92   ;;  %v2352_v8 = vld [vmem:[%s3752_s2] sm:$0xff]  ;;  %v2768_v15 = vld [vmem:[%s3753_s1 + $0x8] sm:$0xff]  ;;  %vm534_vm3 = vcmask 1031168  }
   0x3   :  { %s3097_s8 = smov 91   ;;  %s3098_s9 = smov 90   ;;  %3085 = vset.pattern.permute.xlu0 %v3099_v7  ;;  %3086 = vset.pattern.permute.xlu1 %v3099_v7  ;;  %v26_v21 = vld [vmem:[%s3753_s1] sm:$0xff]  ;;  %v3259_v28 = vld [vmem:[%s3753_s1 + $0x10] sm:$0xff]  ;;  %vm797_vm4 = vcmask 900096   ;;  %v3283_v38 = vld [vmem:[%s3753_s1 + $0x18] sm:$0xff] }
   0x4   :  { %vm1060_vm5 = vcmask 891904   ;;  %v3314_v46 = vld [vmem:[%s3753_s1 + $0x20] sm:$0xff]  ;;  %vm1323_vm6 = vcmask 883712   ;;  %v3337_v54 = vld [vmem:[%s3753_s1 + $0x28] sm:$0xff]  ;;  %vm1586_vm7 = vcmask 752640   ;;  %vm1849_vm8 = vcmask 744448  }
   0x5   :  { %vm2112_vm9 = vcmask 736256   ;;  %vm2451_vm10 = vcmask 64512   ;;  %vm2762_vm11 = vcmask 9216   ;;  %vm2760_vm12 = vcmask 15360  }
   0x6   :  { %43 = vrot.lane.b32.xlu1 %v3157_v4, %s3091_s25  ;;  %37 = vrot.lane.b32.xlu0 %v3152_v3, %s3091_s25 }
   0xa   :  { %524 = vrot.lane.b32.xlu1 %v3152_v3, %s3092_s28  ;;  %45 = vrot.lane.b32.xlu0 %v3163_v5, %s3091_s25 }
   0xe   :  { %522 = vrot.lane.b32.xlu1 %v3144_v1, %s3092_s28  ;;  %526 = vrot.lane.b32.xlu0 %v3139_v0, %s3092_s28 }
  0x12   :  { %532 = vrot.lane.b32.xlu1 %v3163_v5, %s3092_s28  ;;  %530 = vrot.lane.b32.xlu0 %v3157_v4, %s3092_s28 }
  0x16   :  { %789 = vrot.lane.b32.xlu1 %v3139_v0, %s3093_s0  ;;  %787 = vrot.lane.b32.xlu0 %v3152_v3, %s3093_s0 }
  0x1a   :  { %793 = vrot.lane.b32.xlu1 %v3157_v4, %s3093_s0  ;;  %785 = vrot.lane.b32.xlu0 %v3144_v1, %s3093_s0 }
  0x1e   :  { %41 = vrot.lane.b32.xlu1 %v3175_v6, %s3091_s25  ;;  %795 = vrot.lane.b32.xlu0 %v3163_v5, %s3093_s0 }
  0x22   :  { %1052 = vrot.lane.b32.xlu1 %v3139_v0, %s3094_s29  ;;  %1050 = vrot.lane.b32.xlu0 %v3152_v3, %s3094_s29 }
  0x26   :  { %1056 = vrot.lane.b32.xlu1 %v3157_v4, %s3094_s29  ;;  %1048 = vrot.lane.b32.xlu0 %v3144_v1, %s3094_s29 }
  0x2a   :  { %1313 = vrot.lane.b32.xlu1 %v3152_v3, %s3095_s30  ;;  %1058 = vrot.lane.b32.xlu0 %v3163_v5, %s3094_s29 }
  0x2e   :  { %1311 = vrot.lane.b32.xlu1 %v3144_v1, %s3095_s30  ;;  %1315 = vrot.lane.b32.xlu0 %v3139_v0, %s3095_s30 }
  0x32   :  { %1321 = vrot.lane.b32.xlu1 %v3163_v5, %s3095_s30  ;;  %1319 = vrot.lane.b32.xlu0 %v3157_v4, %s3095_s30 }
  0x36   :  { %1576 = vrot.lane.b32.xlu1 %v3152_v3, %s3096_s7  ;;  %528 = vrot.lane.b32.xlu0 %v3175_v6, %s3092_s28 }
  0x3a   :  { %1574 = vrot.lane.b32.xlu1 %v3144_v1, %s3096_s7  ;;  %1578 = vrot.lane.b32.xlu0 %v3139_v0, %s3096_s7 }
  0x3e   :  { %1584 = vrot.lane.b32.xlu1 %v3163_v5, %s3096_s7  ;;  %1582 = vrot.lane.b32.xlu0 %v3157_v4, %s3096_s7 }
  0x42   :  { %1839 = vrot.lane.b32.xlu1 %v3152_v3, %s3097_s8  ;;  %791 = vrot.lane.b32.xlu0 %v3175_v6, %s3093_s0 }
  0x46   :  { %1837 = vrot.lane.b32.xlu1 %v3144_v1, %s3097_s8  ;;  %1841 = vrot.lane.b32.xlu0 %v3139_v0, %s3097_s8 }
  0x4a   :  { %1847 = vrot.lane.b32.xlu1 %v3163_v5, %s3097_s8  ;;  %1845 = vrot.lane.b32.xlu0 %v3157_v4, %s3097_s8 }
  0x4e   :  { %2102 = vrot.lane.b32.xlu1 %v3152_v3, %s3098_s9  ;;  %1054 = vrot.lane.b32.xlu0 %v3175_v6, %s3094_s29 }
  0x52   :  { %2100 = vrot.lane.b32.xlu1 %v3144_v1, %s3098_s9  ;;  %2104 = vrot.lane.b32.xlu0 %v3139_v0, %s3098_s9 }
  0x56   :  { %1580 = vrot.lane.b32.xlu1 %v3175_v6, %s3096_s7  ;;  %1317 = vrot.lane.b32.xlu0 %v3175_v6, %s3095_s30 }
  0x5a   :  { %2106 = vrot.lane.b32.xlu1 %v3175_v6, %s3098_s9  ;;  %1843 = vrot.lane.b32.xlu0 %v3175_v6, %s3097_s8 }
  0x5e   :  { %2110 = vrot.lane.b32.xlu1 %v3163_v5, %s3098_s9  ;;  %2108 = vrot.lane.b32.xlu0 %v3157_v4, %s3098_s9 }
  0x62   :  { %2355 = vperm.xlu0 %3085, %v2352_v8  }
  0x74   :  { %v40_v9 = vpop.permute.xlu0 %39  ;;  %v36_v10 = vpop.permute.xlu1 %35 }
  0x78   :  { %v44_v11 = vpop.permute.xlu1 %43  ;;  %v38_v12 = vpop.permute.xlu0 %37 }
  0x79   :  { %v49_v13 = vsel %vm47_vm0, %v38_v12, %v40_v9  ;;  %v48_v14 = vsel %vm47_vm0, %v36_v10, %v38_v12 }
  0x7a   :  { %2769 = vmatprep.subr.msk.mxu0 %vm57_vm1, %v49_v13 }
  0x7b   :  { %2770 = vmatpush1.msk.msra.mxu0 %vm57_vm1, %v48_v14 }
  0x7c   :  { %v525_v16 = vpop.permute.xlu1 %524  ;;  %2771 = vmatmul.mubr.msk.f32.vlgmr.msra.gmra.mrb[0].mxu0 %vm53_vm2, %v2768_v15  ;;  %v46_v17 = vpop.permute.xlu0 %45 }
  0x7d   :  { %v52_v18 = vsel %vm47_vm0, %v44_v11, %v46_v17  ;;  %2775 = vmatprep.subr.msk.mxu0 %vm57_vm1, %v46_v17  ;;  %276 = vmatprep.mubr.f32.mxu0 %v3090_v2 }
  0x7e   :  { %2776 = vmatpush1.msk.msra.mxu0 %vm57_vm1, %v52_v18 }
  0x7f   :  { %2778 = vmatprep.subr.msk.mxu0 %vm57_vm1, %v3152_v3  ;;  %v3369_v3 = vld [vmem:[%s3753_s1 + $0x30] sm:$0xff] }
  0x80   :  { %v523_v19 = vpop.permute.xlu1 %522  ;;  %2777 = vmatmul.mubr.msk.f32.vlgmr.msra.gmra.mrb[2].mxu0 %vm53_vm2, %v2768_v15  ;;  %v3231_v20 = vpop.permute.xlu0 %526 }
  0x81   :  { %2779 = vmatpush1.msk.msra.mxu0 %vm57_vm1, %v3144_v1  ;;  %362 = vmatprep.mubr.f32.mxu0 %v3090_v2  ;;  %v536_v24 = vsel %vm534_vm3, %v525_v16, %v3231_v20  ;;  %v535_v25 = vsel %vm534_vm3, %v523_v19, %v525_v16 }
  0x82   :  { %2784 = vmatprep.subr.msk.mxu0 %vm57_vm1, %v3163_v5 }
  0x84   :  { %v533_v22 = vpop.permute.xlu1 %532  ;;  %2780 = vmatmul.mubr.msk.f32.vlgmr.msra.gmra.mrb[0].mxu0 %vm53_vm2, %v26_v21  ;;  %v3242_v23 = vpop.permute.xlu0 %530 }
  0x85   :  { %2785 = vmatpush1.msk.msra.mxu0 %vm57_vm1, %v3157_v4  ;;  %504 = vmatprep.mubr.f32.mxu0 %v3090_v2  ;;  %v539_v29 = vsel %vm534_vm3, %v3242_v23, %v533_v22 }
  0x86   :  { %2788 = vmatprep.subr.msk.mxu0 %vm57_vm1, %v536_v24 }
  0x88   :  { %v3251_v26 = vpop.permute.xlu1 %789  ;;  %2786 = vmatmul.mubr.msk.f32.vlgmr.msra.gmra.mrb[2].mxu0 %vm53_vm2, %v26_v21  ;;  %v788_v27 = vpop.permute.xlu0 %787 }
  0x89   :  { %2789 = vmatpush1.msk.msra.mxu0 %vm57_vm1, %v535_v25  ;;  %619 = vmatprep.mubr.f32.mxu0 %v3090_v2  ;;  %v799_v32 = vsel %vm797_vm4, %v788_v27, %v3251_v26 }
  0x8a   :  { %2794 = vmatprep.subr.msk.mxu0 %vm57_vm1, %v533_v22 }
  0x8c   :  { %v3264_v30 = vpop.permute.xlu1 %793  ;;  %2790 = vmatmul.mubr.msk.f32.vlgmr.msra.gmra.mrb[0].mxu0 %vm53_vm2, %v3259_v28  ;;  %v786_v31 = vpop.permute.xlu0 %785 }
  0x8d   :  { %2795 = vmatpush1.msk.msra.mxu0 %vm57_vm1, %v539_v29  ;;  %761 = vmatprep.mubr.f32.mxu0 %v3090_v2  ;;  %v798_v33 = vsel %vm797_vm4, %v786_v31, %v788_v27  ;;  %v3426_v27 = vld [vmem:[%s3753_s1 + $0x40] sm:$0xff] }
  0x8e   :  { %2798 = vmatprep.subr.msk.mxu0 %vm57_vm1, %v799_v32 }
  0x90   :  { %v42_v34 = vpop.permute.xlu1 %41  ;;  %2796 = vmatmul.mubr.msk.f32.vlgmr.msra.gmra.mrb[2].mxu0 %vm53_vm2, %v3259_v28  ;;  %v796_v35 = vpop.permute.xlu0 %795 }
  0x91   :  { %2799 = vmatpush1.msk.msra.mxu0 %vm57_vm1, %v798_v33  ;;  %v51_v36 = vsel %vm47_vm0, %v42_v34, %v44_v11  ;;  %v50_v37 = vsel %vm47_vm0, %v40_v9, %v42_v34  ;;  %882 = vmatprep.mubr.f32.mxu0 %v3090_v2  ;;  %v802_v39 = vsel %vm797_vm4, %v3264_v30, %v796_v35 }
  0x92   :  { %2804 = vmatprep.subr.msk.mxu0 %vm57_vm1, %v796_v35  ;;  %2772 = vmatprep.subr.msk.mxu1 %vm57_vm1, %v51_v36 }
  0x93   :  { %2773 = vmatpush1.msk.msra.mxu1 %vm57_vm1, %v50_v37  ;;  %v2434_v37 = vld [vmem:[%s3754_s5 + $0x200] sm:$0xff] }
  0x94   :  { %v3290_v40 = vpop.permute.xlu1 %1052  ;;  %2800 = vmatmul.mubr.msk.f32.vlgmr.msra.gmra.mrb[0].mxu0 %vm53_vm2, %v3283_v38  ;;  %v1051_v41 = vpop.permute.xlu0 %1050  ;;  %2774 = vmatmul.mubr.msk.f32.vlgmr.msra.gmra.mrb[0].mxu1 %vm53_vm2, %v2768_v15  ;;  %v3399_v15 = vld [vmem:[%s3753_s1 + $0x38] sm:$0xff] }
  0x95   :  { %2805 = vmatpush1.msk.msra.mxu0 %vm57_vm1, %v802_v39  ;;  %v1062_v42 = vsel %vm1060_vm5, %v1051_v41, %v3290_v40  ;;  %1024 = vmatprep.mubr.f32.mxu0 %v3090_v2 }
  0x96   :  { %2808 = vmatprep.subr.msk.mxu0 %vm57_vm1, %v1062_v42  ;;  %2781 = vmatprep.subr.msk.mxu1 %vm57_vm1, %v3175_v6 }
  0x97   :  { %2782 = vmatpush1.msk.msra.mxu1 %vm57_vm1, %v3139_v0  ;;  %433 = vmatprep.mubr.f32.mxu1 %v3090_v2 }
  0x98   :  { %v3305_v43 = vpop.permute.xlu1 %1056  ;;  %v1049_v44 = vpop.permute.xlu0 %1048  ;;  %2806 = vmatmul.mubr.msk.f32.vlgmr.msra.gmra.mrb[2].mxu0 %vm53_vm2, %v3283_v38 }
  0x99   :  { %v1061_v45 = vsel %vm1060_vm5, %v1049_v44, %v1051_v41  ;;  %1145 = vmatprep.mubr.f32.mxu0 %v3090_v2  ;;  %v2437_v44 = vld [vmem:[%s3754_s5 + $0x218] sm:$0xff] }
  0x9a   :  { %2809 = vmatpush1.msk.msra.mxu0 %vm57_vm1, %v1061_v45 }
  0x9c   :  { %v1314_v47 = vpop.permute.xlu1 %1313  ;;  %v1059_v48 = vpop.permute.xlu0 %1058  ;;  %2810 = vmatmul.mubr.msk.f32.vlgmr.msra.gmra.mrb[0].mxu0 %vm53_vm2, %v3314_v46  ;;  %2783 = vmatmul.mubr.msk.f32.vlgmr.msra.gmra.mrb[0].mxu1 %vm53_vm2, %v26_v21 }
  0x9d   :  { %v1065_v49 = vsel %vm1060_vm5, %v3305_v43, %v1059_v48  ;;  %2814 = vmatprep.subr.msk.mxu0 %vm57_vm1, %v1059_v48  ;;  %1287 = vmatprep.mubr.f32.mxu0 %v3090_v2 }
  0x9e   :  { %2815 = vmatpush1.msk.msra.mxu0 %vm57_vm1, %v1065_v49  ;;  %690 = vmatprep.mubr.f32.mxu1 %v3090_v2  ;;  %v2438_v49 = vld [vmem:[%s3754_s5 + $0x220] sm:$0xff] }
  0xa0   :  { %v1312_v50 = vpop.permute.xlu1 %1311  ;;  %v3326_v51 = vpop.permute.xlu0 %1315  ;;  %2816 = vmatmul.mubr.msk.f32.vlgmr.msra.gmra.mrb[2].mxu0 %vm53_vm2, %v3314_v46 }
  0xa1   :  { %v1324_v52 = vsel %vm1323_vm6, %v1312_v50, %v1314_v47  ;;  %v1325_v53 = vsel %vm1323_vm6, %v1314_v47, %v3326_v51  ;;  %1408 = vmatprep.mubr.f32.mxu0 %v3090_v2  ;;  %v2439_v50 = vld [vmem:[%s3754_s5 + $0x228] sm:$0xff] }
  0xa2   :  { %2818 = vmatprep.subr.msk.mxu0 %vm57_vm1, %v1325_v53  ;;  %v3009_v53 = vpack.c.bf16 %v2439_v50, %v2438_v49  ;;  %v2419_v49 = vld [vmem:[%s3754_s5 + $0x188] sm:$0xff] }
  0xa3   :  { %2819 = vmatpush1.msk.msra.mxu0 %vm57_vm1, %v1324_v52  ;;  %v2387_v52 = vld [vmem:[%s3754_s5 + $0x88] sm:$0xff] }
  0xa4   :  { %v1322_v55 = vpop.permute.xlu1 %1321  ;;  %v3341_v56 = vpop.permute.xlu0 %1319  ;;  %2820 = vmatmul.mubr.msk.f32.vlgmr.msra.gmra.mrb[0].mxu0 %vm53_vm2, %v3337_v54 }
  0xa5   :  { %v1328_v57 = vsel %vm1323_vm6, %v3341_v56, %v1322_v55  ;;  %2824 = vmatprep.subr.msk.mxu0 %vm57_vm1, %v1322_v55  ;;  %1550 = vmatprep.mubr.f32.mxu0 %v3090_v2  ;;  %v2441_v55 = vld [vmem:[%s3754_s5 + $0x238] sm:$0xff] }
  0xa6   :  { %2825 = vmatpush1.msk.msra.mxu0 %vm57_vm1, %v1328_v57 }
  0xa8   :  { %v1577_v58 = vpop.permute.xlu1 %1576  ;;  %v529_v59 = vpop.permute.xlu0 %528  ;;  %2826 = vmatmul.mubr.msk.f32.vlgmr.msra.gmra.mrb[2].mxu0 %vm53_vm2, %v3337_v54 }
  0xa9   :  { %v537_v60 = vsel %vm534_vm3, %v3231_v20, %v529_v59  ;;  %v538_v61 = vsel %vm534_vm3, %v529_v59, %v3242_v23  ;;  %1671 = vmatprep.mubr.f32.mxu0 %v3090_v2  ;;  %v2370_v59 = vld [vmem:[%s3754_s5] sm:$0xff] }
  0xaa   :  { %2791 = vmatprep.subr.msk.mxu1 %vm57_vm1, %v538_v61  ;;  %v2388_v61 = vld [vmem:[%s3754_s5 + $0x90] sm:$0xff] }
  0xab   :  { %2792 = vmatpush1.msk.msra.mxu1 %vm57_vm1, %v537_v60  ;;  %v2371_v60 = vld [vmem:[%s3754_s5 + $0x8] sm:$0xff] }
  0xac   :  { %v1575_v62 = vpop.permute.xlu1 %1574  ;;  %v3359_v63 = vpop.permute.xlu0 %1578  ;;  %2793 = vmatmul.mubr.msk.f32.vlgmr.msra.gmra.mrb[0].mxu1 %vm53_vm2, %v3259_v28 }
  0xad   :  { %v1587_v0 = vsel %vm1586_vm7, %v1575_v62, %v1577_v58  ;;  %v1588_v1 = vsel %vm1586_vm7, %v1577_v58, %v3359_v63  ;;  %953 = vmatprep.mubr.f32.mxu1 %v3090_v2  ;;  %v2389_v62 = vld [vmem:[%s3754_s5 + $0x98] sm:$0xff] }
  0xae   :  { %2828 = vmatprep.subr.msk.mxu0 %vm57_vm1, %v1588_v1  ;;  %v2372_v1 = vld [vmem:[%s3754_s5 + $0x10] sm:$0xff] }
  0xaf   :  { %2829 = vmatpush1.msk.msra.mxu0 %vm57_vm1, %v1587_v0  ;;  %v2942_v0 = vpack.c.bf16 %v2389_v62, %v2388_v61  ;;  %v2402_v61 = vld [vmem:[%s3754_s5 + $0x100] sm:$0xff]  ;;  %v2403_v62 = vld [vmem:[%s3754_s5 + $0x108] sm:$0xff] }
  0xb0   :  { %v1585_v4 = vpop.permute.xlu1 %1584  ;;  %v1583_v5 = vpop.permute.xlu0 %1582  ;;  %2830 = vmatmul.mubr.msk.f32.vlgmr.msra.gmra.mrb[0].mxu0 %vm53_vm2, %v3369_v3 }
  0xb1   :  { %v1591_v6 = vsel %vm1586_vm7, %v1583_v5, %v1585_v4  ;;  %2834 = vmatprep.subr.msk.mxu0 %vm57_vm1, %v1585_v4  ;;  %1813 = vmatprep.mubr.f32.mxu0 %v3090_v2  ;;  %v2390_v4 = vld [vmem:[%s3754_s5 + $0xa0] sm:$0xff] }
  0xb2   :  { %2835 = vmatpush1.msk.msra.mxu0 %vm57_vm1, %v1591_v6 }
  0xb4   :  { %v1840_v7 = vpop.permute.xlu1 %1839  ;;  %v792_v8 = vpop.permute.xlu0 %791  ;;  %2836 = vmatmul.mubr.msk.f32.vlgmr.msra.gmra.mrb[2].mxu0 %vm53_vm2, %v3369_v3 }
  0xb5   :  { %v800_v9 = vsel %vm797_vm4, %v3251_v26, %v792_v8  ;;  %v801_v10 = vsel %vm797_vm4, %v792_v8, %v3264_v30  ;;  %1934 = vmatprep.mubr.f32.mxu0 %v3090_v2  ;;  %v2374_v8 = vld [vmem:[%s3754_s5 + $0x20] sm:$0xff] }
  0xb6   :  { %2801 = vmatprep.subr.msk.mxu1 %vm57_vm1, %v801_v10  ;;  %v2392_v10 = vld [vmem:[%s3754_s5 + $0xb0] sm:$0xff] }
  0xb7   :  { %2802 = vmatpush1.msk.msra.mxu1 %vm57_vm1, %v800_v9  ;;  %v2375_v9 = vld [vmem:[%s3754_s5 + $0x28] sm:$0xff] }
  0xb8   :  { %v1838_v11 = vpop.permute.xlu1 %1837  ;;  %v3389_v12 = vpop.permute.xlu0 %1841  ;;  %2803 = vmatmul.mubr.msk.f32.vlgmr.msra.gmra.mrb[0].mxu1 %vm53_vm2, %v3283_v38  ;;  %v2435_v38 = vld [vmem:[%s3754_s5 + $0x208] sm:$0xff] }
  0xb9   :  { %v1850_v13 = vsel %vm1849_vm8, %v1838_v11, %v1840_v7  ;;  %v1851_v14 = vsel %vm1849_vm8, %v1840_v7, %v3389_v12  ;;  %1216 = vmatprep.mubr.f32.mxu1 %v3090_v2  ;;  %v3003_v41 = vpack.c.bf16 %v2435_v38, %v2434_v37  ;;  %v2393_v11 = vld [vmem:[%s3754_s5 + $0xb8] sm:$0xff]  ;;  %v2400_v38 = vld [vmem:[%s3754_s5 + $0xf0] sm:$0xff] }
  0xba   :  { %2838 = vmatprep.subr.msk.mxu0 %vm57_vm1, %v1851_v14  ;;  %v2376_v14 = vld [vmem:[%s3754_s5 + $0x30] sm:$0xff] }
  0xbb   :  { %2839 = vmatpush1.msk.msra.mxu0 %vm57_vm1, %v1850_v13  ;;  %v2950_v13 = vpack.c.bf16 %v2393_v11, %v2392_v10 }
  0xbc   :  { %v1848_v16 = vpop.permute.xlu1 %1847  ;;  %v1846_v17 = vpop.permute.xlu0 %1845  ;;  %2840 = vmatmul.mubr.msk.f32.vlgmr.msra.gmra.mrb[0].mxu0 %vm53_vm2, %v3399_v15 }
  0xbd   :  { %v1854_v18 = vsel %vm1849_vm8, %v1846_v17, %v1848_v16  ;;  %2844 = vmatprep.subr.msk.mxu0 %vm57_vm1, %v1848_v16  ;;  %2076 = vmatprep.mubr.f32.mxu0 %v3090_v2  ;;  %v2394_v16 = vld [vmem:[%s3754_s5 + $0xc0] sm:$0xff] }
  0xbe   :  { %2845 = vmatpush1.msk.msra.mxu0 %vm57_vm1, %v1854_v18 }
  0xc0   :  { %v2103_v19 = vpop.permute.xlu1 %2102  ;;  %v1055_v20 = vpop.permute.xlu0 %1054  ;;  %2846 = vmatmul.mubr.msk.f32.vlgmr.msra.gmra.mrb[2].mxu0 %vm53_vm2, %v3399_v15 }
  0xc1   :  { %v1063_v21 = vsel %vm1060_vm5, %v3290_v40, %v1055_v20  ;;  %v1064_v22 = vsel %vm1060_vm5, %v1055_v20, %v3305_v43  ;;  %2197 = vmatprep.mubr.f32.mxu0 %v3090_v2  ;;  %v2436_v43 = vld [vmem:[%s3754_s5 + $0x210] sm:$0xff]  ;;  %v2378_v20 = vld [vmem:[%s3754_s5 + $0x40] sm:$0xff] }
  0xc2   :  { %2811 = vmatprep.subr.msk.mxu1 %vm57_vm1, %v1064_v22  ;;  %v3006_v48 = vpack.c.bf16 %v2437_v44, %v2436_v43  ;;  %v2396_v22 = vld [vmem:[%s3754_s5 + $0xd0] sm:$0xff] }
  0xc3   :  { %2812 = vmatpush1.msk.msra.mxu1 %vm57_vm1, %v1063_v21  ;;  %v2379_v21 = vld [vmem:[%s3754_s5 + $0x48] sm:$0xff]  ;;  %v2444_v44 = vld [vmem:[%s3754_s5 + $0x250] sm:$0xff] }
  0xc4   :  { %v2101_v23 = vpop.permute.xlu1 %2100  ;;  %2813 = vmatmul.mubr.msk.f32.vlgmr.msra.gmra.mrb[0].mxu1 %vm53_vm2, %v3314_v46  ;;  %v2105_v24 = vpop.permute.xlu0 %2104  ;;  %v3100_v46 = vmov 0.0|0.0  }
  0xc5   :  { %v2113_v25 = vsel %vm2112_vm9, %v2101_v23, %v2103_v19  ;;  %v2114_v26 = vsel %vm2112_vm9, %v2103_v19, %v2105_v24  ;;  %1479 = vmatprep.mubr.f32.mxu1 %v3090_v2  ;;  %v2397_v23 = vld [vmem:[%s3754_s5 + $0xd8] sm:$0xff] }
  0xc6   :  { %2848 = vmatprep.subr.msk.mxu0 %vm57_vm1, %v2114_v26  ;;  %v2380_v26 = vld [vmem:[%s3754_s5 + $0x50] sm:$0xff] }
  0xc7   :  { %2849 = vmatpush1.msk.msra.mxu0 %vm57_vm1, %v2113_v25  ;;  %v2958_v25 = vpack.c.bf16 %v2397_v23, %v2396_v22  ;;  %v2408_v22 = vld [vmem:[%s3754_s5 + $0x130] sm:$0xff]  ;;  %v2409_v23 = vld [vmem:[%s3754_s5 + $0x138] sm:$0xff] }
  0xc8   :  { %v1581_v28 = vpop.permute.xlu1 %1580  ;;  %2850 = vmatmul.mubr.msk.f32.vlgmr.msra.gmra.mrb[0].mxu0 %vm53_vm2, %v3426_v27  ;;  %v1318_v29 = vpop.permute.xlu0 %1317 }
  0xc9   :  { %v1326_v30 = vsel %vm1323_vm6, %v3326_v51, %v1318_v29  ;;  %v1327_v31 = vsel %vm1323_vm6, %v1318_v29, %v3341_v56  ;;  %2339 = vmatprep.mubr.f32.mxu0 %v3090_v2  ;;  %v1590_v32 = vsel %vm1586_vm7, %v1581_v28, %v1583_v5  ;;  %v1589_v33 = vsel %vm1586_vm7, %v3359_v63, %v1581_v28  ;;  %v2386_v51 = vld [vmem:[%s3754_s5 + $0x80] sm:$0xff]  ;;  %v2391_v5 = vld [vmem:[%s3754_s5 + $0xa8] sm:$0xff] }
  0xca   :  { %2821 = vmatprep.subr.msk.mxu1 %vm57_vm1, %v1327_v31  ;;  %v2938_v56 = vpack.c.bf16 %v2387_v52, %v2386_v51  ;;  %v2940_v63 = vpack.c.bf16 %v2371_v60, %v2370_v59  ;;  %v2946_v7 = vpack.c.bf16 %v2391_v5, %v2390_v4  ;;  %v2398_v28 = vld [vmem:[%s3754_s5 + $0xe0] sm:$0xff]  ;;  %v2399_v29 = vld [vmem:[%s3754_s5 + $0xe8] sm:$0xff] }
  0xcb   :  { %2822 = vmatpush1.msk.msra.mxu1 %vm57_vm1, %v1326_v30  ;;  %v2962_v31 = vpack.c.bf16 %v2399_v29, %v2398_v28  ;;  %v2446_v51 = vld [vmem:[%s3754_s5 + $0x260] sm:$0xff]  ;;  %v2447_v52 = vld [vmem:[%s3754_s5 + $0x268] sm:$0xff]  ;;  %v2984_v28 = vpack.c.bf16 %v2409_v23, %v2408_v22 }
  0xcc   :  { %v2107_v34 = vpop.permute.xlu1 %2106  ;;  %2823 = vmatmul.mubr.msk.f32.vlgmr.msra.gmra.mrb[0].mxu1 %vm53_vm2, %v3337_v54  ;;  %2831 = vmatprep.subr.msk.mxu1 %vm57_vm1, %v1590_v32  ;;  %v1844_v35 = vpop.permute.xlu0 %1843  ;;  %v2440_v54 = vld [vmem:[%s3754_s5 + $0x230] sm:$0xff]  ;;  %v2382_v32 = vld [vmem:[%s3754_s5 + $0x60] sm:$0xff] }
  0xcd   :  { %v1853_v36 = vsel %vm1849_vm8, %v1844_v35, %v1846_v17  ;;  %2832 = vmatpush1.msk.msra.mxu1 %vm57_vm1, %v1589_v33  ;;  %1742 = vmatprep.mubr.f32.mxu1 %v3090_v2  ;;  %v1852_v47 = vsel %vm1849_vm8, %v3389_v12, %v1844_v35  ;;  %v2115_v57 = vsel %vm2112_vm9, %v2105_v24, %v2107_v34  ;;  %v2395_v17 = vld [vmem:[%s3754_s5 + $0xc8] sm:$0xff]  ;;  %v2442_v35 = vld [vmem:[%s3754_s5 + $0x240] sm:$0xff] }
  0xce   :  { %2841 = vmatprep.subr.msk.mxu1 %vm57_vm1, %v1853_v36  ;;  %v3012_v58 = vpack.c.bf16 %v2441_v55, %v2440_v54  ;;  %v2948_v12 = vpack.c.bf16 %v2375_v9, %v2374_v8  ;;  %v2954_v19 = vpack.c.bf16 %v2395_v17, %v2394_v16  ;;  %v2956_v24 = vpack.c.bf16 %v2379_v21, %v2378_v20  ;;  %v2383_v33 = vld [vmem:[%s3754_s5 + $0x68] sm:$0xff]  ;;  %v2448_v54 = vld [vmem:[%s3754_s5 + $0x270] sm:$0xff]  ;;  %v2449_v55 = vld [vmem:[%s3754_s5 + $0x278] sm:$0xff] }
  0xcf   :  { %v2443_v36 = vld [vmem:[%s3754_s5 + $0x248] sm:$0xff]  ;;  %v2422_v8 = vld [vmem:[%s3754_s5 + $0x1a0] sm:$0xff] }
  0xd0   :  { %v2111_v39 = vpop.permute.xlu1 %2110  ;;  %v2109_v40 = vpop.permute.xlu0 %2108  ;;  %v3015_v37 = vpack.c.bf16 %v2443_v36, %v2442_v35  ;;  %v2423_v9 = vld [vmem:[%s3754_s5 + $0x1a8] sm:$0xff]  ;;  %v2412_v36 = vld [vmem:[%s3754_s5 + $0x150] sm:$0xff] }
  0xd1   :  { %v2117_v42 = vsel %vm2112_vm9, %v2109_v40, %v2111_v39  ;;  %2854 = vmatprep.subr.msk.mxu0 %vm57_vm1, %v2111_v39  ;;  %v2116_v45 = vsel %vm2112_vm9, %v2107_v34, %v2109_v40  ;;  %v2964_v34 = vpack.c.bf16 %v2383_v33, %v2382_v32  ;;  %v2401_v39 = vld [vmem:[%s3754_s5 + $0xf8] sm:$0xff]  ;;  %v2978_v11 = vpack.c.bf16 %v2423_v9, %v2422_v8  ;;  %v2428_v32 = vld [vmem:[%s3754_s5 + $0x1d0] sm:$0xff] }
  0xd2   :  { %2855 = vmatpush1.msk.msra.mxu0 %vm57_vm1, %v2117_v42  ;;  %v2966_v40 = vpack.c.bf16 %v2401_v39, %v2400_v38  ;;  %v2385_v42 = vld [vmem:[%s3754_s5 + $0x78] sm:$0xff]  ;;  %v2430_v38 = vld [vmem:[%s3754_s5 + $0x1e0] sm:$0xff]  ;;  %v2431_v39 = vld [vmem:[%s3754_s5 + $0x1e8] sm:$0xff] }
  0xd3   :  { %2856 = vmatmul.mubr.msk.f32.vlgmr.msra.gmra.mrb[2].mxu0 %vm53_vm2, %v3426_v27  ;;  %3002 = vmatprep.subr.bf16.mxu0 %v3100_v46  ;;  %v2429_v33 = vld [vmem:[%s3754_s5 + $0x1d8] sm:$0xff] }
  0xd4   :  { %2833 = vmatmul.mubr.msk.f32.vlgmr.msra.gmra.mrb[0].mxu1 %vm53_vm2, %v3369_v3  ;;  %3004 = vmatpush1.bf16.msra.mxu0 %v3003_v41  ;;  %v2373_v3 = vld [vmem:[%s3754_s5 + $0x18] sm:$0xff]  ;;  %v2384_v41 = vld [vmem:[%s3754_s5 + $0x70] sm:$0xff]  ;;  %v2990_v35 = vpack.c.bf16 %v2429_v33, %v2428_v32 }
  0xd5   :  { %2842 = vmatpush1.msk.msra.mxu1 %vm57_vm1, %v1852_v47  ;;  %2005 = vmatprep.mubr.f32.mxu1 %v3090_v2  ;;  %v2944_v6 = vpack.c.bf16 %v2373_v3, %v2372_v1  ;;  %v2968_v43 = vpack.c.bf16 %v2385_v42, %v2384_v41  ;;  %v2972_v3 = vpack.c.bf16 %v2403_v62, %v2402_v61  ;;  %v2414_v42 = vld [vmem:[%s3754_s5 + $0x160] sm:$0xff] }
  0xd6   :  { %2851 = vmatprep.subr.msk.mxu1 %vm57_vm1, %v2116_v45  ;;  %3005 = vmatprep.subr.bf16.mxu0 %v3100_v46  ;;  %v2445_v45 = vld [vmem:[%s3754_s5 + $0x258] sm:$0xff]  ;;  %v2994_v41 = vpack.c.bf16 %v2431_v39, %v2430_v38 }
  0xd7   :  { %v3018_v47 = vpack.c.bf16 %v2445_v45, %v2444_v44  ;;  %v2432_v44 = vld [vmem:[%s3754_s5 + $0x1f0] sm:$0xff]  ;;  %v2433_v45 = vld [vmem:[%s3754_s5 + $0x1f8] sm:$0xff] }
  0xd8   :  { %3007 = vmatpush1.bf16.msra.mxu0 %v3006_v48  ;;  %v2418_v48 = vld [vmem:[%s3754_s5 + $0x180] sm:$0xff] }
  0xd9   :  { %3008 = vmatprep.subr.bf16.mxu0 %v3100_v46  ;;  %v2970_v50 = vpack.c.bf16 %v2419_v49, %v2418_v48 }
  0xdc   :  { %2843 = vmatmul.mubr.msk.f32.vlgmr.msra.gmra.mrb[0].mxu1 %vm53_vm2, %v3399_v15  ;;  %3010 = vmatpush1.bf16.msra.mxu0 %v3009_v53  ;;  %v2377_v15 = vld [vmem:[%s3754_s5 + $0x38] sm:$0xff]  ;;  %v3021_v53 = vpack.c.bf16 %v2447_v52, %v2446_v51  ;;  %v2416_v51 = vld [vmem:[%s3754_s5 + $0x170] sm:$0xff] }
  0xdd   :  { %2852 = vmatpush1.msk.msra.mxu1 %vm57_vm1, %v2115_v57  ;;  %2268 = vmatprep.mubr.f32.mxu1 %v3090_v2  ;;  %v2952_v18 = vpack.c.bf16 %v2377_v15, %v2376_v14  ;;  %v2450_v57 = vld [vmem:[%s3754_s5 + $0x280] sm:$0xff]  ;;  %v2424_v14 = vld [vmem:[%s3754_s5 + $0x1b0] sm:$0xff]  ;;  %v2425_v15 = vld [vmem:[%s3754_s5 + $0x1b8] sm:$0xff] }
  0xde   :  { %2939 = vmatprep.subr.bf16.mxu1 %v2938_v56  ;;  %3011 = vmatprep.subr.bf16.mxu0 %v3100_v46  ;;  %v3024_v56 = vpack.c.bf16 %v2449_v55, %v2448_v54  ;;  %v2982_v21 = vpack.c.bf16 %v2425_v15, %v2424_v14  ;;  %v2417_v52 = vld [vmem:[%s3754_s5 + $0x178] sm:$0xff] }
  0xdf   :  { %v3000_v55 = vpack.c.bf16 %v2417_v52, %v2416_v51 }
  0xe0   :  { %3013 = vmatpush1.bf16.msra.mxu0 %v3012_v58 }
  0xe1   :  { %3014 = vmatprep.subr.bf16.mxu0 %v3100_v46  ;;  %v3632_v58 = vpop.permute.xlu0 %2355 }
  0xe4   :  { %2853 = vmatmul.mubr.msk.f32.vlgmr.msra.gmra.mrb[0].mxu1 %vm53_vm2, %v3426_v27  ;;  %v2381_v27 = vld [vmem:[%s3754_s5 + $0x58] sm:$0xff]  ;;  %3016 = vmatpush1.bf16.msra.mxu0 %v3015_v37 }
  0xe5   :  { %2941 = vmatpush3.bf16.msra.mxu1 %v2940_v63  ;;  %v2960_v30 = vpack.c.bf16 %v2381_v27, %v2380_v26  ;;  %3017 = vmatprep.subr.bf16.mxu0 %v3100_v46  ;;  %v2420_v63 = vld [vmem:[%s3754_s5 + $0x190] sm:$0xff]  ;;  %v2413_v37 = vld [vmem:[%s3754_s5 + $0x158] sm:$0xff] }
  0xe6   :  { %2943 = vmatprep.subr.bf16.mxu1 %v2942_v0  ;;  %v2421_v0 = vld [vmem:[%s3754_s5 + $0x198] sm:$0xff] }
  0xe7   :  { %v2974_v5 = vpack.c.bf16 %v2421_v0, %v2420_v63 }
  0xe8   :  { %3019 = vmatpush1.bf16.msra.mxu0 %v3018_v47 }
  0xe9   :  { %2945 = vmatpush3.bf16.msra.mxu1 %v2944_v6  ;;  %3020 = vmatprep.subr.bf16.mxu0 %v3100_v46  ;;  %v2404_v6 = vld [vmem:[%s3754_s5 + $0x110] sm:$0xff] }
  0xea   :  { %2947 = vmatprep.subr.bf16.mxu1 %v2946_v7  ;;  %v2405_v7 = vld [vmem:[%s3754_s5 + $0x118] sm:$0xff] }
  0xeb   :  { %v2976_v10 = vpack.c.bf16 %v2405_v7, %v2404_v6  ;;  %v2666_v6 = vld [vmem:[%s3755_s3 + $0x8] sm:$0x3] }
  0xec   :  { %3022 = vmatpush1.bf16.msra.mxu0 %v3021_v53 }
  0xed   :  { %2949 = vmatpush3.bf16.msra.mxu1 %v2948_v12  ;;  %3023 = vmatprep.subr.bf16.mxu0 %v3100_v46  ;;  %v2406_v12 = vld [vmem:[%s3754_s5 + $0x120] sm:$0xff] }
  0xee   :  { %2951 = vmatprep.subr.bf16.mxu1 %v2950_v13  ;;  %v2407_v13 = vld [vmem:[%s3754_s5 + $0x128] sm:$0xff] }
  0xf0   :  { %3025 = vmatpush1.bf16.msra.mxu0 %v3024_v56 }
  0xf1   :  { %2953 = vmatpush3.bf16.msra.mxu1 %v2952_v18  ;;  %2627 = vmatprep.subr.mxu0 %v3090_v2 }
  0xf2   :  { %2955 = vmatprep.subr.bf16.mxu1 %v2954_v19  ;;  %v2980_v19 = vpack.c.bf16 %v2407_v13, %v2406_v12 }
  0xf4   :  { %2628 = vmatpush1.msra.mxu0 %v2450_v57 }
  0xf5   :  { %2957 = vmatpush3.bf16.msra.mxu1 %v2956_v24  ;;  %v2426_v24 = vld [vmem:[%s3754_s5 + $0x1c0] sm:$0xff] }
  0xf6   :  { %2959 = vmatprep.subr.bf16.mxu1 %v2958_v25  ;;  %v2427_v25 = vld [vmem:[%s3754_s5 + $0x1c8] sm:$0xff] }
  0xf7   :  { %v2986_v29 = vpack.c.bf16 %v2427_v25, %v2426_v24 }
  0xf9   :  { %2961 = vmatpush3.bf16.msra.mxu1 %v2960_v30  ;;  %v2410_v30 = vld [vmem:[%s3754_s5 + $0x140] sm:$0xff] }
  0xfa   :  { %2963 = vmatprep.subr.bf16.mxu1 %v2962_v31  ;;  %v2411_v31 = vld [vmem:[%s3754_s5 + $0x148] sm:$0xff] }
  0xfd   :  { %2965 = vmatpush3.bf16.msra.mxu1 %v2964_v34  ;;  %v2988_v34 = vpack.c.bf16 %v2411_v31, %v2410_v30 }
  0xfe   :  { %2967 = vmatprep.subr.bf16.mxu1 %v2966_v40  ;;  %v2992_v40 = vpack.c.bf16 %v2413_v37, %v2412_v36 }
 0x101   :  { %2969 = vmatpush3.bf16.msra.mxu1 %v2968_v43  ;;  %v2415_v43 = vld [vmem:[%s3754_s5 + $0x168] sm:$0xff] }
 0x102   :  { %2971 = vmatprep.subr.bf16.mxu1 %v2970_v50  ;;  %v2996_v48 = vpack.c.bf16 %v2415_v43, %v2414_v42  ;;  %v2998_v50 = vpack.c.bf16 %v2433_v45, %v2432_v44 }
 0x19b   :  { %v2199_v46 = vpop.f32.mrb[0].mxu0 }
 0x19c   :  { %v2201_v59 = vpop.f32.mrb[1].mxu0  ;;  %v2358_v60 = vadd.f32 %v3632_v58, %v2199_v46  ;;  %v2665_v46 = vld [vmem:[%s3755_s3] sm:$0xff] }
 0x19d   :  { %v2359_v2 = vadd.f32 %v3632_v58, %v2201_v59  ;;  %v2667_v59 = vld [vmem:[%s3756_s4] sm:$0xff] }
 0x19e   :  { %v2364_v4 = vmax.f32 %v2358_v60, 0.0  ;;  %2671 = vperm.xlu1 %3086, %v2667_v59  }
 0x19f   :  { %v2365_v1 = vmax.f32 %v2359_v2, 0.0 }
 0x1a1   :  { %2519 = vmatprep.mubr.f32.mxu1 %v2365_v1 }
 0x1a2   :  { %2520 = vmatmul.mubr.f32.vlgmr.msra.gmra.mrb[2].mxu1 %v2364_v4 }
 0x1a3   :  { %2973 = vmatpush3.bf16.msra.mxu1 %v2972_v3 }
 0x1a4   :  { %2975 = vmatprep.subr.bf16.mxu1 %v2974_v5 }
 0x1a6   :  { %v2341_v16 = vpop.f32.mrb[2].mxu0 }
 0x1a7   :  { %v2362_v17 = vadd.f32 %v3632_v58, %v2341_v16  ;;  %2977 = vmatpush3.bf16.msra.mxu1 %v2976_v10  ;;  %v2343_v18 = vpop.f32.mrb[3].mxu0 }
 0x1a8   :  { %v2363_v20 = vadd.f32 %v3632_v58, %v2343_v18  ;;  %2979 = vmatprep.subr.bf16.mxu1 %v2978_v11 }
 0x1a9   :  { %v2368_v27 = vmax.f32 %v2362_v17, 0.0 }
 0x1aa   :  { %v2369_v26 = vmax.f32 %v2363_v20, 0.0 }
 0x1ab   :  { %2981 = vmatpush3.bf16.msra.mxu1 %v2980_v19 }
 0x1ac   :  { %2857 = vmatprep.mubr.msk.f32.mxu0 %vm2451_vm10, %v2369_v26  ;;  %2983 = vmatprep.subr.bf16.mxu1 %v2982_v21 }
 0x1ad   :  { %2660 = vmatmul.mubr.f32.vlgmr.msra.gmra.mrb[4].mxu0 %v2368_v27 }
 0x1af   :  { %2985 = vmatpush3.bf16.msra.mxu1 %v2984_v28 }
 0x1b0   :  { %2987 = vmatprep.subr.bf16.mxu1 %v2986_v29 }
 0x1b3   :  { %2989 = vmatpush3.bf16.msra.mxu1 %v2988_v34 }
 0x1b4   :  { %2991 = vmatprep.subr.bf16.mxu1 %v2990_v35 }
 0x1b7   :  { %2993 = vmatpush3.bf16.msra.mxu1 %v2992_v40  ;;  %v2270_v47 = vpop.f32.mrb[0].mxu1 }
 0x1b8   :  { %v2272_v49 = vpop.f32.mrb[1].mxu1  ;;  %2995 = vmatprep.subr.bf16.mxu1 %v2994_v41  ;;  %v2360_v56 = vadd.f32 %v3632_v58, %v2270_v47 }
 0x1b9   :  { %v2361_v53 = vadd.f32 %v3632_v58, %v2272_v49  ;;  %v2668_v58 = vld [vmem:[%s3756_s4 + $0x8] sm:$0x3] }
 0x1ba   :  { %v2366_v57 = vmax.f32 %v2360_v56, 0.0  ;;  %2676 = vperm.xlu1 %3086, %v2668_v58  }
 0x1bb   :  { %v2367_v54 = vmax.f32 %v2361_v53, 0.0  ;;  %2997 = vmatpush3.bf16.msra.mxu1 %v2996_v48 }
 0x1bc   :  { %2999 = vmatprep.subr.bf16.mxu1 %v2998_v50 }
 0x1bd   :  { %2589 = vmatprep.mubr.f32.mxu1 %v2367_v54 }
 0x1bf   :  { %3001 = vmatpush3.bf16.msra.mxu1 %v3000_v55 }
 0x1c2   :  { %2590 = vmatmul.mubr.f32.vlgmr.msra.gmra.mrb[4].mxu1 %v2366_v57 }
 0x1c3   :  { %2935 = vmatprep.mubr.msk.f32.mxu1 %vm2451_vm10, %v2665_v46 }
 0x21d   :  { %v2672_v7 = vpop.permute.xlu1 %2671 }
 0x239   :  { %v2677_v9 = vpop.permute.xlu1 %2676 }
 0x275   :  { %v2892_v60 = vpop.f32.mrb[2].mxu1 }
 0x276   :  { %v2893_v61 = vpop.f32.mrb[3].mxu1 }
 0x277   :  { %v2894_v62 = vadd.f32 %v2893_v61, %v2892_v60 }
 0x280   :  { %v2661_v2 = vpop.f32.mrb[4].mxu0 }
 0x281   :  { %v2663_v63 = vpop.f32.mrb[5].mxu0 }
 0x295   :  { %v2927_v0 = vpop.f32.mrb[4].mxu1 }
 0x296   :  { %v2928_v1 = vpop.f32.mrb[5].mxu1 }
 0x297   :  { %v2929_v3 = vadd.f32 %v2928_v1, %v2927_v0 }
 0x299   :  { %v2592_v4 = vadd.f32 %v2929_v3, %v2894_v62 }
 0x29b   :  { %v2662_v5 = vadd.f32 %v2661_v2, %v2592_v4 }
 0x29d   :  { %2933 = vmatprep.subr.mxu1 %v2662_v5 }
 0x29e   :  { %2934 = vmatpush3.msra.mxu1 %v2662_v5 }
 0x29f   :  { %2936 = vmatmul.mubr.msk.f32.vlgmr.msra.gmra.mrb[6].mxu1 %vm2451_vm10, %v2666_v6 }
 0x372   :  { %v2937_v8 = vpop.f32.mrb[6].mxu1 }
 0x373   :  { %v2757_v10 = vadd.f32 %v2937_v8, %v2677_v9  ;;  %v2751_v11 = vpop.f32.mrb[7].mxu1 }
 0x374   :  { %v2752_v12 = vadd.f32 %v2751_v11, %v2672_v7 }
 0x375   :  { %2763 = vst.msk [vmem:[%s3757_s6 + $0x8] sm:$0x3] %vm2762_vm11, %v2757_v10 }
 0x376   :  { %2761 = vst.msk [vmem:[%s3757_s6] sm:$0xff] %vm2760_vm12, %v2752_v12 }

</bundles_post_ra>
